<compile_context>
chip_gen: v5e
topology: v5e:2x2
jax: 0.10.0
libtpu: 0.0.40
codegen_flags: <defaults>
</compile_context>

<pallas_src>
import functools

import jax
import jax.numpy as jnp
from jax.experimental import pallas as pl
from jax.experimental.pallas import tpu as pltpu

_EPS = 1e-12  # eps guard for L2 normalization (torch F.normalize-style)


def _round_up(v, m):
    return (v + m - 1) // m * m


# ----------------------------- Pallas kernel --------------------------------

def _fused_stable_gm_kernel(a_s_ref, x_s_ref, a_t_ref, x_t_ref, w_ref, b_ref,
                            sim_ref):
    """Fused f_update (dense GCN, both graphs) + L2 norm + similarity.

    a_s_ref : (R_s, K_s)   bf16 normalized adjacency of the source graph
    x_s_ref : (K_s, D_pad) bf16 source node features (zero-padded lanes)
    a_t_ref : (R_t, K_t)   bf16 normalized adjacency of the target graph
    x_t_ref : (K_t, D_pad) bf16 target node features (zero-padded lanes)
    w_ref   : (D_pad, H_pad) bf16 shared GCN weight
    b_ref   : (1, H_pad)     f32  shared GCN bias
    sim_ref : (R_s, R_t)     f32  similarity, rows = source, cols = target
                                  (R_t is a multiple of 128 → lane-dense vst)
    """
    w = w_ref[...]
    b = b_ref[...]

    def gcn_norm(a, x):
        # Aggregation + dense update on the MXU (bf16 in, f32 accumulate).
        agg = jnp.dot(a, x, preferred_element_type=jnp.float32)
        h = jnp.dot(agg.astype(jnp.bfloat16), w,
                    preferred_element_type=jnp.float32) + b
        h = jnp.maximum(h, 0.0)
        # Row-wise L2 normalization: eps-guarded rsqrt (EUP slot) so all-zero
        # rows (possible after ReLU) do not produce NaN/Inf.
        inv = jax.lax.rsqrt(jnp.sum(h * h, axis=-1, keepdims=True) + _EPS)
        return (h * inv).astype(jnp.bfloat16)

    h_s = gcn_norm(a_s_ref[...], x_s_ref[...])   # (R_s, H_pad)
    h_t = gcn_norm(a_t_ref[...], x_t_ref[...])   # (R_t, H_pad)

    # sim = h_s_n @ h_t_n^T  (contract over the hidden dim).  Only the target
    # rows are contracted — the output lane dim R_t is already a dense
    # multiple of 128, no stacked-rows trick needed.
    sim_ref[...] = jax.lax.dot_general(
        h_s, h_t, (((1,), (1,)), ((), ())),
        preferred_element_type=jnp.float32)


# ------------------------------ Pallas wrapper -------------------------------

def _full_spec(shape):
    # Whole-array block, single grid step (everything fits comfortably in VMEM
    # at these sizes: well under 1 MiB total).
    return pl.BlockSpec(shape, lambda i: (0,) * len(shape))


def stable_gm_forward(params, x_s, edge_index_s, x_t, edge_index_t):
    """_StableGM.forward(graph_s, graph_t, train=False) -> sim_mat (1, n_s, n_t)."""
    # TODO(synk): edge_attr is accepted by f_update in the reference code but
    # the synthetic GCN f_update does not consume edge attributes.
    # TODO(synk): train=True branch (log_sinkhorn + ContrastiveLossWithAttention
    # loss) is not implemented; only the inference forward (sim_mat) is produced.
    n_s, f_in = x_s.shape
    n_t = x_t.shape[0]
    f_hidden = params["w"].shape[1]

    # Padded shapes: sublane (8) alignment on sim rows, lane (128) alignment on
    # contraction / output-lane dims.
    r_s = _round_up(n_s, 8)       # sim rows / A_s rows
    k_s = _round_up(n_s, 128)     # A_s cols = X_s rows (contraction, lane-dense)
    r_t = _round_up(n_t, 128)     # sim cols (lane-dense) / A_t rows
    k_t = _round_up(n_t, 128)     # A_t cols = X_t rows
    d_pad = _round_up(f_in, 128)
    h_pad = _round_up(f_hidden, 128)

    a_s = normalized_adjacency(edge_index_s, n_s)
    a_t = normalized_adjacency(edge_index_t, n_t)

    # One pad op per operand (no repeated .at[].set full-array scatters);
    # matmul operands cast to bf16, bias kept f32 (added post-accumulation).
    a_s_p = jnp.pad(a_s, ((0, r_s - n_s), (0, k_s - n_s))).astype(jnp.bfloat16)
    x_s_p = jnp.pad(x_s, ((0, k_s - n_s), (0, d_pad - f_in))).astype(jnp.bfloat16)
    a_t_p = jnp.pad(a_t, ((0, r_t - n_t), (0, k_t - n_t))).astype(jnp.bfloat16)
    x_t_p = jnp.pad(x_t, ((0, k_t - n_t), (0, d_pad - f_in))).astype(jnp.bfloat16)
    w_p = jnp.pad(params["w"],
                  ((0, d_pad - f_in), (0, h_pad - f_hidden))).astype(jnp.bfloat16)
    b_p = jnp.pad(params["b"], ((0, 0), (0, h_pad - f_hidden))).astype(jnp.float32)

    flops = (2 * r_s * k_s * d_pad + 2 * r_t * k_t * d_pad    # A @ X (both graphs)
             + 2 * (r_s + r_t) * d_pad * h_pad                # @ W
             + 2 * r_s * r_t * h_pad)                         # similarity
    bytes_accessed = (2 * (a_s_p.size + x_s_p.size + a_t_p.size + x_t_p.size
                           + w_p.size)
                      + 4 * b_p.size + 4 * r_s * r_t)
    cost = pl.CostEstimate(flops=flops, transcendentals=r_s + r_t,
                           bytes_accessed=bytes_accessed)

    # Explicit VMEM budget with headroom (v5e scoped default is only 16 MiB);
    # clamp to 32 MiB so it also respects v7x's smaller physical VMEM.
    vmem_limit = int(min(max(4 * bytes_accessed, 4 << 20), 32 << 20))

    sim_full = pl.pallas_call(
        _fused_stable_gm_kernel,
        grid=(1,),
        in_specs=[_full_spec(a_s_p.shape), _full_spec(x_s_p.shape),
                  _full_spec(a_t_p.shape), _full_spec(x_t_p.shape),
                  _full_spec(w_p.shape), _full_spec(b_p.shape)],
        out_specs=_full_spec((r_s, r_t)),
        out_shape=jax.ShapeDtypeStruct((r_s, r_t), jnp.float32),
        compiler_params=pltpu.CompilerParams(
            dimension_semantics=("arbitrary",),
            vmem_limit_bytes=vmem_limit),
        cost_estimate=cost,
    )(a_s_p, x_s_p, a_t_p, x_t_p, w_p, b_p)
    # TODO(synk): for realistic graph sizes replace the whole-array grid=(1,)
    # specs with a tiled grid (node-row axes "parallel" — shards across v7x's
    # 2 TensorCores — contraction axis last marked "arbitrary", f32 VMEM
    # accumulator with pl.when init/finalize, h_t staged once in VMEM and
    # reused across sim row-tiles) and a sparse neighbor-gather aggregation
    # via PrefetchScalarGridSpec instead of the dense A@X.
    # TODO(synk): with a single grid step the big operands could request
    # pipeline_mode=pl.Buffered(1) to reclaim the unused second pipeline buffer.

    sim = sim_full[:n_s, :n_t]                  # drop row/column padding
    # h_s.dim()==h_t.dim()==2 -> unsqueeze(0) in the reference module.
    return sim[None, :, :]


# --------------------------------- Glue --------------------------------------

def normalized_adjacency(edge_index, n):
    """Dense symmetric GCN-normalized adjacency  D^-1/2 (A + I) D^-1/2."""
    a = jnp.zeros((n, n), jnp.float32)
    a = a.at[edge_index[0], edge_index[1]].set(1.0)
    a = a.at[edge_index[1], edge_index[0]].set(1.0)
    # maximum (not +eye) so pre-existing self-loops are not double-counted.
    a = jnp.maximum(a, jnp.eye(n, dtype=jnp.float32))
    d_inv_sqrt = jax.lax.rsqrt(jnp.sum(a, axis=-1))
    return a * d_inv_sqrt[:, None] * d_inv_sqrt[None, :]


# ---------------------------- Pure-JAX reference -----------------------------

def _ref_forward(params, x_s, edge_index_s, x_t, edge_index_t):
    """Mirrors the kernel's numerics (bf16 MXU operands, f32 accumulation)."""
    a_s = normalized_adjacency(edge_index_s, x_s.shape[0])
    a_t = normalized_adjacency(edge_index_t, x_t.shape[0])
    w = params["w"].astype(jnp.bfloat16)
    b = params["b"].astype(jnp.float32)

    def upd(a, x):
        agg = jnp.dot(a.astype(jnp.bfloat16), x.astype(jnp.bfloat16),
                      preferred_element_type=jnp.float32)
        h = jnp.dot(agg.astype(jnp.bfloat16), w,
                    preferred_element_type=jnp.float32) + b
        h = jnp.maximum(h, 0.0)
        h_n = h * jax.lax.rsqrt(jnp.sum(h * h, axis=-1, keepdims=True) + _EPS)
        return h_n.astype(jnp.bfloat16)

    hs = upd(a_s, x_s)
    ht = upd(a_t, x_t)
    sim = jax.lax.dot_general(hs, ht, (((1,), (1,)), ((), ())),
                              preferred_element_type=jnp.float32)
    return sim[None, :, :]


# ----------------------------------- Main ------------------------------------

if __name__ == "__main__":
    n_s, n_t = 64, 64          # nodes in source / target graphs
    f_in, f_hidden = 32, 32    # input / f_update output feature dims

    key = jax.random.PRNGKey(0)
    k_xs, k_xt, k_w, k_b = jax.random.split(key, 4)

    x_s = jax.random.normal(k_xs, (n_s, f_in), dtype=jnp.float32)
    x_t = jax.random.normal(k_xt, (n_t, f_in), dtype=jnp.float32)

    # deterministic ring graphs for edge_index (shape (2, E))
    idx_s = jnp.arange(n_s, dtype=jnp.int32)
    edge_index_s = jnp.stack([idx_s, (idx_s + 1) % n_s], axis=0)
    idx_t = jnp.arange(n_t, dtype=jnp.int32)
    edge_index_t = jnp.stack([idx_t, (idx_t + 1) % n_t], axis=0)

    # deterministic f_update parameters (single GCN layer, shared for s/t)
    params = {
        "w": jax.random.normal(k_w, (f_in, f_hidden), dtype=jnp.float32) * 0.1,
        "b": jax.random.normal(k_b, (1, f_hidden), dtype=jnp.float32) * 0.01,
    }

    sim = stable_gm_forward(params, x_s, edge_index_s, x_t, edge_index_t)
    sim = jax.block_until_ready(sim)

    ref = _ref_forward(params, x_s, edge_index_s, x_t, edge_index_t)
    assert sim.shape == (1, n_s, n_t), sim.shape
    assert jnp.allclose(sim, ref, atol=2e-3, rtol=2e-3), "mismatch vs JAX reference"

    print("KERNEL_OK")
</pallas_src>

<mosaic_0001>
module attributes {stable_mosaic.version = 11 : i64} {
  func.func @_fused_stable_gm_kernel(%arg0: i32, %arg1: memref<64x128xbf16, #tpu.memory_space<vmem>>, %arg2: memref<128x128xbf16, #tpu.memory_space<vmem>>, %arg3: memref<128x128xbf16, #tpu.memory_space<vmem>>, %arg4: memref<128x128xbf16, #tpu.memory_space<vmem>>, %arg5: memref<128x128xbf16, #tpu.memory_space<vmem>>, %arg6: memref<1x128xf32, #tpu.memory_space<vmem>>, %arg7: memref<64x128xf32, #tpu.memory_space<vmem>>) attributes {dimension_semantics = [#tpu.dimension_semantics<arbitrary>], iteration_bounds = array<i64: 1>, scalar_prefetch = 0 : i64, scratch_operands = 0 : i64, tpu.core_type = #tpu.core_type<tc>, window_params = [{pipeline_mode = #tpu.pipeline_mode<synchronous>, transform_indices = @transform_0, window_bounds = array<i64: 64, 128>}, {pipeline_mode = #tpu.pipeline_mode<synchronous>, transform_indices = @transform_1, window_bounds = array<i64: 128, 128>}, {pipeline_mode = #tpu.pipeline_mode<synchronous>, transform_indices = @transform_2, window_bounds = array<i64: 128, 128>}, {pipeline_mode = #tpu.pipeline_mode<synchronous>, transform_indices = @transform_3, window_bounds = array<i64: 128, 128>}, {pipeline_mode = #tpu.pipeline_mode<synchronous>, transform_indices = @transform_4, window_bounds = array<i64: 128, 128>}, {pipeline_mode = #tpu.pipeline_mode<synchronous>, transform_indices = @transform_5, window_bounds = array<i64: 1, 128>}, {pipeline_mode = #tpu.pipeline_mode<synchronous>, transform_indices = @transform_6, window_bounds = array<i64: 64, 128>}]} {
    %c0 = arith.constant 0 : index
    %c0_0 = arith.constant 0 : index
    %0 = vector.load %arg5[%c0, %c0_0] : memref<128x128xbf16, #tpu.memory_space<vmem>>, vector<128x128xbf16>
    %c0_1 = arith.constant 0 : index
    %c0_2 = arith.constant 0 : index
    %1 = vector.load %arg6[%c0_1, %c0_2] : memref<1x128xf32, #tpu.memory_space<vmem>>, vector<1x128xf32>
    %c0_3 = arith.constant 0 : index
    %c0_4 = arith.constant 0 : index
    %2 = vector.load %arg1[%c0_3, %c0_4] : memref<64x128xbf16, #tpu.memory_space<vmem>>, vector<64x128xbf16>
    %c0_5 = arith.constant 0 : index
    %c0_6 = arith.constant 0 : index
    %3 = vector.load %arg2[%c0_5, %c0_6] : memref<128x128xbf16, #tpu.memory_space<vmem>>, vector<128x128xbf16>
    %cst = arith.constant dense<0.000000e+00> : vector<64x128xf32>
    %4 = tpu.matmul %2, %3, %cst {dimension_numbers = #tpu.dot_dimension_numbers<[1], [0], [0], [1], [0, 0, 1, 1], [], []>} : vector<64x128xbf16>, vector<128x128xbf16>, vector<64x128xf32> -> vector<64x128xf32>
    %5 = arith.truncf %4 : vector<64x128xf32> to vector<64x128xbf16>
    %cst_7 = arith.constant dense<0.000000e+00> : vector<64x128xf32>
    %6 = tpu.matmul %5, %0, %cst_7 {dimension_numbers = #tpu.dot_dimension_numbers<[1], [0], [0], [1], [0, 0, 1, 1], [], []>} : vector<64x128xbf16>, vector<128x128xbf16>, vector<64x128xf32> -> vector<64x128xf32>
    %7 = vector.broadcast %1 : vector<1x128xf32> to vector<64x128xf32>
    %8 = arith.addf %6, %7 : vector<64x128xf32>
    %cst_8 = arith.constant 0.000000e+00 : f32
    %9 = vector.broadcast %cst_8 : f32 to vector<64x128xf32>
    %10 = arith.maximumf %8, %9 : vector<64x128xf32>
    %11 = arith.mulf %10, %10 : vector<64x128xf32>
    %cst_9 = arith.constant dense<0.000000e+00> : vector<64xf32>
    %12 = vector.multi_reduction <add>, %11, %cst_9 [1] : vector<64x128xf32> to vector<64xf32>
    %13 = vector.shape_cast %12 : vector<64xf32> to vector<64x1xf32>
    %cst_10 = arith.constant 9.99999996E-13 : f32
    %14 = vector.broadcast %cst_10 : f32 to vector<64x1xf32>
    %15 = arith.addf %13, %14 : vector<64x1xf32>
    %16 = math.rsqrt %15 : vector<64x1xf32>
    %17 = vector.broadcast %16 : vector<64x1xf32> to vector<64x128xf32>
    %18 = arith.mulf %10, %17 : vector<64x128xf32>
    %19 = arith.truncf %18 : vector<64x128xf32> to vector<64x128xbf16>
    %c0_11 = arith.constant 0 : index
    %c0_12 = arith.constant 0 : index
    %20 = vector.load %arg3[%c0_11, %c0_12] : memref<128x128xbf16, #tpu.memory_space<vmem>>, vector<128x128xbf16>
    %c0_13 = arith.constant 0 : index
    %c0_14 = arith.constant 0 : index
    %21 = vector.load %arg4[%c0_13, %c0_14] : memref<128x128xbf16, #tpu.memory_space<vmem>>, vector<128x128xbf16>
    %cst_15 = arith.constant dense<0.000000e+00> : vector<128x128xf32>
    %22 = tpu.matmul %20, %21, %cst_15 {dimension_numbers = #tpu.dot_dimension_numbers<[1], [0], [0], [1], [0, 0, 1, 1], [], []>} : vector<128x128xbf16>, vector<128x128xbf16>, vector<128x128xf32> -> vector<128x128xf32>
    %23 = arith.truncf %22 : vector<128x128xf32> to vector<128x128xbf16>
    %cst_16 = arith.constant dense<0.000000e+00> : vector<128x128xf32>
    %24 = tpu.matmul %23, %0, %cst_16 {dimension_numbers = #tpu.dot_dimension_numbers<[1], [0], [0], [1], [0, 0, 1, 1], [], []>} : vector<128x128xbf16>, vector<128x128xbf16>, vector<128x128xf32> -> vector<128x128xf32>
    %25 = vector.broadcast %1 : vector<1x128xf32> to vector<128x128xf32>
    %26 = arith.addf %24, %25 : vector<128x128xf32>
    %cst_17 = arith.constant 0.000000e+00 : f32
    %27 = vector.broadcast %cst_17 : f32 to vector<128x128xf32>
    %28 = arith.maximumf %26, %27 : vector<128x128xf32>
    %29 = arith.mulf %28, %28 : vector<128x128xf32>
    %cst_18 = arith.constant dense<0.000000e+00> : vector<128xf32>
    %30 = vector.multi_reduction <add>, %29, %cst_18 [1] : vector<128x128xf32> to vector<128xf32>
    %31 = vector.shape_cast %30 : vector<128xf32> to vector<128x1xf32>
    %cst_19 = arith.constant 9.99999996E-13 : f32
    %32 = vector.broadcast %cst_19 : f32 to vector<128x1xf32>
    %33 = arith.addf %31, %32 : vector<128x1xf32>
    %34 = math.rsqrt %33 : vector<128x1xf32>
    %35 = vector.broadcast %34 : vector<128x1xf32> to vector<128x128xf32>
    %36 = arith.mulf %28, %35 : vector<128x128xf32>
    %37 = arith.truncf %36 : vector<128x128xf32> to vector<128x128xbf16>
    %cst_20 = arith.constant dense<0.000000e+00> : vector<64x128xf32>
    %38 = tpu.matmul %19, %37, %cst_20 {dimension_numbers = #tpu.dot_dimension_numbers<[1], [1], [0], [0], [0, 0, 1, 0], [], []>} : vector<64x128xbf16>, vector<128x128xbf16>, vector<64x128xf32> -> vector<64x128xf32>
    %c0_21 = arith.constant 0 : index
    %c0_22 = arith.constant 0 : index
    %39 = vector.load %arg7[%c0_21, %c0_22] : memref<64x128xf32, #tpu.memory_space<vmem>>, vector<64x128xf32>
    tpu.vector_store %arg7[%c0_21, %c0_22], %38 {strides = array<i32>} : memref<64x128xf32, #tpu.memory_space<vmem>>, vector<64x128xf32>,
    return
  }
  func.func @transform_0(%arg0: i32) -> (i32, i32) {
    %c0_i32 = arith.constant 0 : i32
    %c0_i32_0 = arith.constant 0 : i32
    %c0_i32_1 = arith.constant 0 : i32
    return %c0_i32, %c0_i32_0 : i32, i32
  }
  func.func @transform_1(%arg0: i32) -> (i32, i32) {
    %c0_i32 = arith.constant 0 : i32
    %c0_i32_0 = arith.constant 0 : i32
    %c0_i32_1 = arith.constant 0 : i32
    return %c0_i32, %c0_i32_0 : i32, i32
  }
  func.func @transform_2(%arg0: i32) -> (i32, i32) {
    %c0_i32 = arith.constant 0 : i32
    %c0_i32_0 = arith.constant 0 : i32
    %c0_i32_1 = arith.constant 0 : i32
    return %c0_i32, %c0_i32_0 : i32, i32
  }
  func.func @transform_3(%arg0: i32) -> (i32, i32) {
    %c0_i32 = arith.constant 0 : i32
    %c0_i32_0 = arith.constant 0 : i32
    %c0_i32_1 = arith.constant 0 : i32
    return %c0_i32, %c0_i32_0 : i32, i32
  }
  func.func @transform_4(%arg0: i32) -> (i32, i32) {
    %c0_i32 = arith.constant 0 : i32
    %c0_i32_0 = arith.constant 0 : i32
    %c0_i32_1 = arith.constant 0 : i32
    return %c0_i32, %c0_i32_0 : i32, i32
  }
  func.func @transform_5(%arg0: i32) -> (i32, i32) {
    %c0_i32 = arith.constant 0 : i32
    %c0_i32_0 = arith.constant 0 : i32
    %c0_i32_1 = arith.constant 0 : i32
    return %c0_i32, %c0_i32_0 : i32, i32
  }
  func.func @transform_6(%arg0: i32) -> (i32, i32) {
    %c0_i32 = arith.constant 0 : i32
    %c0_i32_0 = arith.constant 0 : i32
    %c0_i32_1 = arith.constant 0 : i32
    return %c0_i32, %c0_i32_0 : i32, i32
  }
}

</mosaic_0001>

<bundles_post_ra>
// kernel: tpu_custom_call.1
= control target key start
LH: loop header
LB: loop body
LE: loop exit
PB: predicated region body
PF: predicated region fallthrough
CT: control target
= control target key end

     0   :  { %11 = vsyncpa [#allocation3], 0  ;;  %s2010_s0 = inlined_call_operand.hbm [shape: bf16[64,128], index: 0, kind: input, shape index: {}]   ;;  %s2011_s1 = inlined_call_operand.hbm [shape: bf16[128,128], index: 1, kind: input, shape index: {}]   ;;  %s2012_s2 = inlined_call_operand.hbm [shape: bf16[128,128], index: 2, kind: input, shape index: {}]   ;;  %s2013_s3 = inlined_call_operand.hbm [shape: bf16[128,128], index: 3, kind: input, shape index: {}]   ;;  %s2014_s4 = inlined_call_operand.hbm [shape: bf16[128,128], index: 4, kind: input, shape index: {}]   ;;  %s2015_s5 = inlined_call_operand.vmem [shape: f32[1,128], index: 5, kind: input, shape index: {}]   ;;  %s2016_s6 = inlined_call_operand.hbm [shape: f32[64,128], index: 6, kind: output, shape index: {}]  }
   0x1   :  { %12 = vsyncpa [#allocation6], 0 }
   0x2   :  { %13 = vsyncpa [#allocation9], 0 }
   0x3   :  { %14 = vsyncpa [#allocation4], 0  ;;  %s32_s23 = sshll.u32 %s2011_s1, 4  ;;  %s1415_s24 = smov [#allocation5]   ;;  %s33_s23 = int_to_ptr.hbm [resolvable:$true] %s32_s23 }
   0x4   :  { %s34_s25 = sshll.u32 %s1415_s24, 4  ;;  %s58_s28 = sshll.u32 %s2013_s3, 4  ;;  %s35_s25 = int_to_ptr.vmem [resolvable:$true] %s34_s25  ;;  %s59_s28 = int_to_ptr.hbm [resolvable:$true] %s58_s28 }
   0x5   :  { %s1416_s29 = smov 64   ;;  %s1417_s30 = smov 4  }
   0x6   :  { %40 = dma.hbm_to_vmem [thread:$0]  %s33_s23, 1024, %s35_s25, [#allocation6], %s1416_s29, %s1416_s29, %s1417_s30  }
   0x7   :  { %s1418_s7 = smov [#allocation8]   ;;  %s19_s11 = sshll.u32 %s2010_s0, 4  ;;  %s20_s11 = int_to_ptr.hbm [resolvable:$true] %s19_s11 }
   0x8   :  { %s60_s8 = sshll.u32 %s1418_s7, 4  ;;  %s45_s13 = sshll.u32 %s2012_s2, 4  ;;  %s61_s8 = int_to_ptr.vmem [resolvable:$true] %s60_s8  ;;  %s46_s13 = int_to_ptr.hbm [resolvable:$true] %s45_s13 }
   0x9   :  { %66 = dma.hbm_to_vmem [thread:$0]  %s59_s28, 1024, %s61_s8, [#allocation9], %s1416_s29, %s1416_s29, %s1417_s30  }
   0xa   :  { %s1419_s14 = smov [#allocation2]   ;;  %s1420_s3 = smov [#allocation7]  }
   0xb   :  { %s21_s15 = sshll.u32 %s1419_s14, 4  ;;  %s47_s16 = sshll.u32 %s1420_s3, 4  ;;  %s22_s15 = int_to_ptr.vmem [resolvable:$true] %s21_s15  ;;  %s48_s16 = int_to_ptr.vmem [resolvable:$true] %s47_s16 }
   0xc   :  { %27 = dma.hbm_to_vmem [thread:$0]  %s20_s11, 512, %s22_s15, [#allocation3], %s1416_s29, %s1416_s29, %s1417_s30  }
   0xd   :  { %s71_s19 = sshll.u32 %s2014_s4, 4  ;;  %s1421_s0 = smov [#allocation10]   ;;  %s72_s19 = int_to_ptr.hbm [resolvable:$true] %s71_s19 }
   0xe   :  { %53 = dma.hbm_to_vmem [thread:$0]  %s46_s13, 1024, %s48_s16, [#allocation6], %s1416_s29, %s1416_s29, %s1417_s30  }
   0xf   :  { %s73_s20 = sshll.u32 %s1421_s0, 4  ;;  %s74_s20 = int_to_ptr.vmem [resolvable:$true] %s73_s20 }
  0x10   :  { %79 = dma.hbm_to_vmem [thread:$0]  %s72_s19, 1024, %s74_s20, [#allocation9], %s1416_s29, %s1416_s29, %s1417_s30  }
  0x11   :  { %1407 = dma.done.wait [#allocation3], 512  }
  0x12   :  { %1408 = vsyncadd [#allocation3], 4294966784 }
  0x13   :  { %1409 = dma.done.wait [#allocation6], 2048  }
  0x14   :  { %1410 = vsyncadd [#allocation6], 4294965248 }
  0x15   :  { %1411 = dma.done.wait [#allocation9], 2048  }
  0x16   :  { %1412 = vsyncadd [#allocation9], 4294965248  ;;  %v1195_v0 = vld [vmem:[#allocation8 + $0x38] sm:$0xff]  ;;  %v1194_v1 = vld [vmem:[#allocation8 + $0x30] sm:$0xff]  ;;  %s1001_s24 = sshll.u32 %s2016_s6, 4  ;;  %s1423_s25 = smov 128   ;;  %s1002_s24 = int_to_ptr.hbm [resolvable:$true] %s1001_s24 }
  0x17   :  { %588 = vmatpush.bf16.msra.mxu2 %v1195_v0  ;;  %v1193_v2 = vld [vmem:[#allocation8 + $0x28] sm:$0xff]  ;;  %v1192_v3 = vld [vmem:[#allocation8 + $0x20] sm:$0xff]  ;;  %v1191_v4 = vld [vmem:[#allocation8 + $0x18] sm:$0xff]  ;;  %s1424_s26 = smov 8  }
  0x18   :  { %v1190_v5 = vld [vmem:[#allocation8 + $0x10] sm:$0xff]  ;;  %v1189_v6 = vld [vmem:[#allocation8 + $0x8] sm:$0xff]  ;;  %v1188_v7 = vld [vmem:[#allocation8] sm:$0xff] }
  0x19   :  { %v1180_v8 = vld [vmem:[#allocation7] sm:$0xff]  ;;  %v1181_v9 = vld [vmem:[#allocation7 + $0x8] sm:$0xff]  ;;  %v1179_v10 = vld [vmem:[#allocation5 + $0x38] sm:$0xff] }
  0x1a   :  { %215 = vmatpush.bf16.msra.mxu0 %v1179_v10  ;;  %v1182_v11 = vld [vmem:[#allocation7 + $0x10] sm:$0xff]  ;;  %v1177_v13 = vld [vmem:[#allocation5 + $0x28] sm:$0xff]  ;;  %v1176_v14 = vld [vmem:[#allocation5 + $0x20] sm:$0xff] }
  0x1b   :  { %589 = vmatpush.bf16.msra.mxu2 %v1194_v1  ;;  %v1178_v12 = vld [vmem:[#allocation5 + $0x30] sm:$0xff]  ;;  %v1175_v15 = vld [vmem:[#allocation5 + $0x18] sm:$0xff]  ;;  %v1173_v18 = vld [vmem:[#allocation5 + $0x8] sm:$0xff] }
  0x1c   :  { %v1183_v16 = vld [vmem:[#allocation7 + $0x18] sm:$0xff]  ;;  %v1174_v17 = vld [vmem:[#allocation5 + $0x10] sm:$0xff]  ;;  %v1172_v19 = vld [vmem:[#allocation5] sm:$0xff] }
  0x1d   :  { %v1168_v20 = vld [vmem:[#allocation2] sm:$0xff]  ;;  %v1167_v22 = vld [vmem:[#allocation10 + $0x38] sm:$0xff]  ;;  %v1169_v23 = vld [vmem:[#allocation2 + $0x8] sm:$0xff] }
  0x1e   :  { %216 = vmatpush.bf16.msra.mxu0 %v1178_v12  ;;  %v1184_v21 = vld [vmem:[#allocation7 + $0x20] sm:$0xff]  ;;  %645 = vmatpush.bf16.msra.mxu3 %v1167_v22  ;;  %v1185_v24 = vld [vmem:[#allocation7 + $0x28] sm:$0xff]  ;;  %v1166_v25 = vld [vmem:[#allocation10 + $0x30] sm:$0xff] }
  0x1f   :  { %590 = vmatpush.bf16.msra.mxu2 %v1193_v2  ;;  %299 = vmatpush.bf16.msra.mxu1 %v1167_v22  ;;  %v1165_v26 = vld [vmem:[#allocation10 + $0x28] sm:$0xff]  ;;  %v1164_v27 = vld [vmem:[#allocation10 + $0x20] sm:$0xff]  ;;  %v1170_v28 = vld [vmem:[#allocation2 + $0x10] sm:$0xff] }
  0x20   :  { %v1163_v29 = vld [vmem:[#allocation10 + $0x18] sm:$0xff]  ;;  %v1186_v30 = vld [vmem:[#allocation7 + $0x30] sm:$0xff]  ;;  %v1161_v32 = vld [vmem:[#allocation10 + $0x8] sm:$0xff] }
  0x21   :  { %v1162_v31 = vld [vmem:[#allocation10 + $0x10] sm:$0xff]  ;;  %v1160_v33 = vld [vmem:[#allocation10] sm:$0xff]  ;;  %v1171_v34 = vld [vmem:[#allocation2 + $0x18] sm:$0xff] }
  0x22   :  { %217 = vmatpush.bf16.msra.mxu0 %v1177_v13  ;;  %646 = vmatpush.bf16.msra.mxu3 %v1166_v25  ;;  %v1187_v35 = vld [vmem:[#allocation7 + $0x38] sm:$0xff] }
  0x23   :  { %591 = vmatpush.bf16.msra.mxu2 %v1192_v3  ;;  %300 = vmatpush.bf16.msra.mxu1 %v1166_v25 }
  0x26   :  { %218 = vmatpush.bf16.msra.mxu0 %v1176_v14  ;;  %647 = vmatpush.bf16.msra.mxu3 %v1165_v26 }
  0x27   :  { %592 = vmatpush.bf16.msra.mxu2 %v1191_v4  ;;  %301 = vmatpush.bf16.msra.mxu1 %v1165_v26 }
  0x2a   :  { %219 = vmatpush.bf16.msra.mxu0 %v1175_v15  ;;  %648 = vmatpush.bf16.msra.mxu3 %v1164_v27 }
  0x2b   :  { %593 = vmatpush.bf16.msra.mxu2 %v1190_v5  ;;  %302 = vmatpush.bf16.msra.mxu1 %v1164_v27 }
  0x2e   :  { %220 = vmatpush.bf16.msra.mxu0 %v1174_v17  ;;  %649 = vmatpush.bf16.msra.mxu3 %v1163_v29 }
  0x2f   :  { %594 = vmatpush.bf16.msra.mxu2 %v1189_v6  ;;  %303 = vmatpush.bf16.msra.mxu1 %v1163_v29 }
  0x32   :  { %221 = vmatpush.bf16.msra.mxu0 %v1173_v18  ;;  %650 = vmatpush.bf16.msra.mxu3 %v1162_v31 }
  0x33   :  { %595 = vmatpush.bf16.msra.mxu2 %v1188_v7  ;;  %304 = vmatpush.bf16.msra.mxu1 %v1162_v31 }
  0x36   :  { %596 = vmatmul.bf16.vlgmr.msra.gmra.mxu2 %v1180_v8  ;;  %222 = vmatpush.bf16.msra.mxu0 %v1172_v19 }
  0x37   :  { %651 = vmatpush.bf16.msra.mxu3 %v1161_v32  ;;  %305 = vmatpush.bf16.msra.mxu1 %v1161_v32 }
  0x39   :  { %223 = vmatmul.bf16.vlgmr.msra.gmra.mxu0 %v1168_v20  ;;  %v1488_v20 = vld [vmem:[%s2015_s5] ss:$0 sm:$0xff]  ;;  %s1422_s5 = smov [#allocation11]  }
  0x3a   :  { %s999_s21 = sshll.u32 %s1422_s5, 4  ;;  %s1000_s21 = int_to_ptr.vmem [resolvable:$true] %s999_s21 }
  0x3b   :  { %652 = vmatpush.bf16.msra.mxu3 %v1160_v33  ;;  %306 = vmatpush.bf16.msra.mxu1 %v1160_v33 }
  0x46   :  { %601 = vmatmul.bf16.gmra.mxu2 %v1181_v9 }
  0x49   :  { %228 = vmatmul.bf16.gmra.mxu0 %v1169_v23 }
  0x56   :  { %606 = vmatmul.bf16.gmra.mxu2 %v1182_v11 }
  0x59   :  { %233 = vmatmul.bf16.gmra.mxu0 %v1170_v28 }
  0x66   :  { %611 = vmatmul.bf16.gmra.mxu2 %v1183_v16 }
  0x69   :  { %238 = vmatmul.bf16.gmra.mxu0 %v1171_v34 }
  0x76   :  { %616 = vmatmul.bf16.gmra.mxu2 %v1184_v21 }
  0x86   :  { %621 = vmatmul.bf16.gmra.mxu2 %v1185_v24 }
  0x96   :  { %626 = vmatmul.bf16.gmra.mxu2 %v1186_v30 }
  0xa6   :  { %631 = vmatmul.bf16.gmra.mxu2 %v1187_v35 }
  0xb6   :  { %v224_v46 = vpop.f32.mrf.mxu0 }
  0xb9   :  { %v597_v36 = vpop.f32.mrf.mxu2 }
  0xbe   :  { %v226_v49 = vpop.f32.mrf.mxu0 }
  0xbf   :  { %v244_v50 = vpack.c.bf16 %v226_v49, %v224_v46 }
  0xc1   :  { %v599_v37 = vpop.f32.mrf.mxu2  ;;  %307 = vmatmul.bf16.vlgmr.msra.gmra.mxu1 %v244_v50 }
  0xc2   :  { %v637_v38 = vpack.c.bf16 %v599_v37, %v597_v36 }
  0xc4   :  { %653 = vmatmul.bf16.vlgmr.msra.gmra.mxu3 %v637_v38 }
  0xc6   :  { %v229_v52 = vpop.f32.mrf.mxu0 }
  0xc9   :  { %v602_v39 = vpop.f32.mrf.mxu2 }
  0xce   :  { %v231_v55 = vpop.f32.mrf.mxu0 }
  0xcf   :  { %v245_v56 = vpack.c.bf16 %v231_v55, %v229_v52 }
  0xd1   :  { %v604_v40 = vpop.f32.mrf.mxu2  ;;  %312 = vmatmul.bf16.gmra.mxu1 %v245_v56 }
  0xd2   :  { %v638_v41 = vpack.c.bf16 %v604_v40, %v602_v39 }
  0xd4   :  { %658 = vmatmul.bf16.gmra.mxu3 %v638_v41 }
  0xd6   :  { %v234_v58 = vpop.f32.mrf.mxu0 }
  0xd9   :  { %v607_v42 = vpop.f32.mrf.mxu2 }
  0xde   :  { %v236_v61 = vpop.f32.mrf.mxu0 }
  0xdf   :  { %v246_v62 = vpack.c.bf16 %v236_v61, %v234_v58 }
  0xe1   :  { %v609_v43 = vpop.f32.mrf.mxu2  ;;  %317 = vmatmul.bf16.gmra.mxu1 %v246_v62 }
  0xe2   :  { %v639_v44 = vpack.c.bf16 %v609_v43, %v607_v42 }
  0xe4   :  { %663 = vmatmul.bf16.gmra.mxu3 %v639_v44 }
  0xe6   :  { %v239_v0 = vpop.f32.mrf.mxu0 }
  0xe9   :  { %v612_v45 = vpop.f32.mrf.mxu2 }
  0xee   :  { %v241_v3 = vpop.f32.mrf.mxu0 }
  0xef   :  { %v247_v4 = vpack.c.bf16 %v241_v3, %v239_v0 }
  0xf1   :  { %v614_v47 = vpop.f32.mrf.mxu2  ;;  %322 = vmatmul.bf16.gmra.mxu1 %v247_v4 }
  0xf2   :  { %v640_v48 = vpack.c.bf16 %v614_v47, %v612_v45 }
  0xf4   :  { %668 = vmatmul.bf16.gmra.mxu3 %v640_v48 }
  0xf9   :  { %v617_v51 = vpop.f32.mrf.mxu2 }
 0x101   :  { %v619_v53 = vpop.f32.mrf.mxu2 }
 0x102   :  { %v641_v54 = vpack.c.bf16 %v619_v53, %v617_v51 }
 0x104   :  { %673 = vmatmul.bf16.gmra.mxu3 %v641_v54 }
 0x109   :  { %v622_v57 = vpop.f32.mrf.mxu2 }
 0x111   :  { %v624_v59 = vpop.f32.mrf.mxu2 }
 0x112   :  { %v642_v60 = vpack.c.bf16 %v624_v59, %v622_v57 }
 0x114   :  { %678 = vmatmul.bf16.gmra.mxu3 %v642_v60 }
 0x119   :  { %v627_v63 = vpop.f32.mrf.mxu2 }
 0x121   :  { %v629_v1 = vpop.f32.mrf.mxu2 }
 0x122   :  { %v643_v2 = vpack.c.bf16 %v629_v1, %v627_v63 }
 0x124   :  { %683 = vmatmul.bf16.gmra.mxu3 %v643_v2 }
 0x129   :  { %v632_v5 = vpop.f32.mrf.mxu2 }
 0x131   :  { %v634_v6 = vpop.f32.mrf.mxu2 }
 0x132   :  { %v644_v7 = vpack.c.bf16 %v634_v6, %v632_v5 }
 0x134   :  { %688 = vmatmul.bf16.gmra.mxu3 %v644_v7 }
 0x13e   :  { %v308_v16 = vpop.f32.mrf.mxu1 }
 0x13f   :  { %v309_v1 = vadd.f32 %v1488_v20, %v308_v16 }
 0x141   :  { %v1558_v7 = vmax.f32 %v309_v1, 0.0 }
 0x146   :  { %v1483_v18 = vpop.f32.mrf.mxu1 }
 0x147   :  { %v654_v8 = vpop.f32.mrf.mxu3 }
 0x148   :  { %v655_v48 = vadd.f32 %v1488_v20, %v654_v8 }
 0x14a   :  { %v1529_v52 = vmax.f32 %v655_v48, 0.0 }
 0x14c   :  { %v710_v58 = vmul.f32 %v1529_v52, %v1529_v52 }
 0x14e   :  { %v1490_v21 = vpop.f32.mrf.mxu1 }
 0x14f   :  { %v1475_v9 = vpop.f32.mrf.mxu3 }
 0x156   :  { %v315_v28 = vpop.f32.mrf.mxu1 }
 0x157   :  { %v1477_v10 = vpop.f32.mrf.mxu3  ;;  %v316_v54 = vadd.f32 %v1488_v20, %v315_v28 }
 0x158   :  { %v660_v28 = vadd.f32 %v1488_v20, %v1477_v10 }
 0x159   :  { %v1541_v60 = vmax.f32 %v316_v54, 0.0 }
 0x15b   :  { %v339_v2 = vmul.f32 %v1541_v60, %v1541_v60 }
 0x15e   :  { %v1508_v36 = vpop.f32.mrf.mxu1 }
 0x15f   :  { %v1479_v11 = vpop.f32.mrf.mxu3 }
 0x160   :  { %v662_v3 = vadd.f32 %v1488_v20, %v1479_v11  ;;  %v314_v11 = vadd.f32 %v1488_v20, %v1490_v21 }
 0x162   :  { %v1560_v8 = vmax.f32 %v662_v3, 0.0 }
 0x166   :  { %v320_v47 = vpop.f32.mrf.mxu1 }
 0x167   :  { %v664_v12 = vpop.f32.mrf.mxu3 }
 0x168   :  { %v665_v55 = vadd.f32 %v1488_v20, %v664_v12 }
 0x16a   :  { %v1543_v62 = vmax.f32 %v665_v55, 0.0 }
 0x16c   :  { %v714_v6 = vmul.f32 %v1543_v62, %v1543_v62 }
 0x16e   :  { %v323_v59 = vpop.f32.mrf.mxu1 }
 0x16f   :  { %v666_v13 = vpop.f32.mrf.mxu3 }
 0x170   :  { %v667_v37 = vadd.f32 %v1488_v20, %v666_v13 }
 0x172   :  { %v1515_v41 = vmax.f32 %v667_v37, 0.0 }
 0x174   :  { %v715_v46 = vmul.f32 %v1515_v41, %v1515_v41 }
 0x176   :  { %v325_v13 = vpop.f32.mrf.mxu1 }
 0x177   :  { %v669_v14 = vpop.f32.mrf.mxu3  ;;  %v326_v16 = vadd.f32 %v1488_v20, %v325_v13 }
 0x178   :  { %v670_v30 = vadd.f32 %v1488_v20, %v669_v14  ;;  %v336_v14 = vmul.f32 %v1558_v7, %v1558_v7 }
 0x179   :  { %v1577_v21 = vmax.f32 %v326_v16, 0.0 }
 0x17a   :  { %v1503_v33 = vmax.f32 %v670_v30, 0.0 }
 0x17c   :  { %v716_v39 = vmul.f32 %v1503_v33, %v1503_v33 }
 0x17f   :  { %v1481_v15 = vpop.f32.mrf.mxu3 }
 0x187   :  { %v674_v17 = vpop.f32.mrf.mxu3 }
 0x188   :  { %v675_v4 = vadd.f32 %v1488_v20, %v674_v17  ;;  %v672_v17 = vadd.f32 %v1488_v20, %v1481_v15 }
 0x18a   :  { %v1562_v12 = vmax.f32 %v675_v4, 0.0 }
 0x18f   :  { %v676_v19 = vpop.f32.mrf.mxu3 }
 0x190   :  { %v677_v44 = vadd.f32 %v1488_v20, %v676_v19  ;;  %v718_v19 = vmul.f32 %v1562_v12, %v1562_v12 }
 0x192   :  { %v1526_v50 = vmax.f32 %v677_v44, 0.0 }
 0x194   :  { %v719_v57 = vmul.f32 %v1526_v50, %v1526_v50 }
 0x197   :  { %v679_v22 = vpop.f32.mrf.mxu3 }
 0x198   :  { %v680_v23 = vadd.f32 %v1488_v20, %v679_v22  ;;  %v713_v22 = vmul.f32 %v1560_v8, %v1560_v8 }
 0x19a   :  { %v1493_v24 = vmax.f32 %v680_v23, 0.0  ;;  %v1575_v23 = vmax.f32 %v314_v11, 0.0 }
 0x19c   :  { %v720_v25 = vmul.f32 %v1493_v24, %v1493_v24  ;;  %v338_v15 = vmul.f32 %v1575_v23, %v1575_v23 }
 0x19e   :  { %746 = vadd.xlane.f32.xlu2 %v720_v25  ;;  %v1579_v25 = vmax.f32 %v672_v17, 0.0 }
 0x19f   :  { %v681_v26 = vpop.f32.mrf.mxu3 }
 0x1a0   :  { %v682_v27 = vadd.f32 %v1488_v20, %v681_v26  ;;  %v321_v26 = vadd.f32 %v1488_v20, %v320_v47  ;;  %v717_v30 = vmul.f32 %v1579_v25, %v1579_v25  ;;  %v311_v47 = vadd.f32 %v1488_v20, %v1483_v18 }
 0x1a2   :  { %v1498_v29 = vmax.f32 %v682_v27, 0.0  ;;  %v343_v27 = vmul.f32 %v1577_v21, %v1577_v21  ;;  %v1617_v48 = vmax.f32 %v311_v47, 0.0 }
 0x1a4   :  { %v721_v31 = vmul.f32 %v1498_v29, %v1498_v29 }
 0x1a6   :  { %748 = vadd.xlane.f32.xlu2 %v721_v31  ;;  %v1590_v31 = vmax.f32 %v321_v26, 0.0 }
 0x1a7   :  { %v684_v32 = vpop.f32.mrf.mxu3 }
 0x1a8   :  { %v685_v34 = vadd.f32 %v1488_v20, %v684_v32  ;;  %v1592_v32 = vmax.f32 %v660_v28, 0.0  ;;  %v341_v37 = vmul.f32 %v1590_v31, %v1590_v31 }
 0x1aa   :  { %v1506_v35 = vmax.f32 %v685_v34, 0.0  ;;  %v324_v34 = vadd.f32 %v1488_v20, %v323_v59  ;;  %v712_v10 = vmul.f32 %v1592_v32, %v1592_v32 }
 0x1ac   :  { %v722_v38 = vmul.f32 %v1506_v35, %v1506_v35 }
 0x1ae   :  { %750 = vadd.xlane.f32.xlu1 %v722_v38  ;;  %738 = vadd.xlane.f32.xlu2 %v716_v39  ;;  %v657_v38 = vadd.f32 %v1488_v20, %v1475_v9  ;;  %v1601_v39 = vmax.f32 %v324_v34, 0.0 }
 0x1af   :  { %v686_v40 = vpop.f32.mrf.mxu3 }
 0x1b0   :  { %v687_v42 = vadd.f32 %v1488_v20, %v686_v40  ;;  %v1603_v40 = vmax.f32 %v657_v38, 0.0  ;;  %v342_v44 = vmul.f32 %v1601_v39, %v1601_v39 }
 0x1b2   :  { %v1518_v43 = vmax.f32 %v687_v42, 0.0  ;;  %v319_v42 = vadd.f32 %v1488_v20, %v1508_v36  ;;  %v337_v36 = vmul.f32 %v1617_v48, %v1617_v48 }
 0x1b4   :  { %v723_v45 = vmul.f32 %v1518_v43, %v1518_v43 }
 0x1b6   :  { %752 = vadd.xlane.f32.xlu1 %v723_v45  ;;  %736 = vadd.xlane.f32.xlu2 %v715_v46  ;;  %v711_v45 = vmul.f32 %v1603_v40, %v1603_v40  ;;  %v1611_v46 = vmax.f32 %v319_v42, 0.0 }
 0x1b7   :  { %v689_v49 = vpop.f32.mrf.mxu3 }
 0x1b8   :  { %v690_v51 = vadd.f32 %v1488_v20, %v689_v49  ;;  %v340_v9 = vmul.f32 %v1611_v46, %v1611_v46 }
 0x1ba   :  { %v1531_v53 = vmax.f32 %v690_v51, 0.0 }
 0x1bc   :  { %v724_v56 = vmul.f32 %v1531_v53, %v1531_v53 }
 0x1be   :  { %754 = vadd.xlane.f32.xlu0 %v724_v56  ;;  %744 = vadd.xlane.f32.xlu1 %v719_v57 }
 0x1bf   :  { %726 = vadd.xlane.f32.xlu2 %v710_v58  ;;  %v691_v61 = vpop.f32.mrf.mxu3 }
 0x1c0   :  { %v692_v63 = vadd.f32 %v1488_v20, %v691_v61 }
 0x1c2   :  { %v1546_v0 = vmax.f32 %v692_v63, 0.0 }
 0x1c4   :  { %v725_v5 = vmul.f32 %v1546_v0, %v1546_v0 }
 0x1c6   :  { %756 = vadd.xlane.f32.xlu0 %v725_v5  ;;  %734 = vadd.xlane.f32.xlu1 %v714_v6 }
 0x1c7   :  { %350 = vadd.xlane.f32.xlu2 %v339_v2 }
 0x1ce   :  { %742 = vadd.xlane.f32.xlu0 %v718_v19  ;;  %732 = vadd.xlane.f32.xlu1 %v713_v22 }
 0x1cf   :  { %344 = vadd.xlane.f32.xlu2 %v336_v14 }
 0x1d6   :  { %740 = vadd.xlane.f32.xlu0 %v717_v30  ;;  %348 = vadd.xlane.f32.xlu1 %v338_v15 }
 0x1d7   :  { %358 = vadd.xlane.f32.xlu2 %v343_v27 }
 0x1de   :  { %730 = vadd.xlane.f32.xlu0 %v712_v10  ;;  %354 = vadd.xlane.f32.xlu1 %v341_v37 }
 0x1e6   :  { %728 = vadd.xlane.f32.xlu0 %v711_v45  ;;  %356 = vadd.xlane.f32.xlu1 %v342_v44 }
 0x1ee   :  { %352 = vadd.xlane.f32.xlu0 %v340_v9 }
 0x1f6   :  { %346 = vadd.xlane.f32.xlu0 %v337_v36 }
 0x211   :  { %v747_v51 = vpop.xlane.xlu2 %746 }
 0x212   :  { %v1632_v2 = vadd.f32 1e-12, %v747_v51 }
 0x219   :  { %v749_v59 = vpop.xlane.xlu2 %748 }
 0x21a   :  { %v1629_v63 = vadd.f32 1e-12, %v749_v59 }
 0x21c   :  { %vm890_vm14 = vweird.f32 %v1629_v63 }
 0x221   :  { %v751_v49 = vpop.xlane.xlu1 %750  ;;  %v739_v14 = vpop.xlane.xlu2 %738 }
 0x222   :  { %v1623_v58 = vadd.f32 1e-12, %v751_v49  ;;  %v1660_v47 = vadd.f32 1e-12, %v739_v14 }
 0x224   :  { %vm900_vm10 = vweird.f32 %v1623_v58 }
 0x229   :  { %v753_v54 = vpop.xlane.xlu1 %752 }
 0x22a   :  { %v1621_v57 = vadd.f32 1e-12, %v753_v54 }
 0x22c   :  { %vm910_vm8 = vweird.f32 %v1621_v57 }
 0x231   :  { %v755_v55 = vpop.xlane.xlu0 %754  ;;  %v745_v19 = vpop.xlane.xlu1 %744 }
 0x232   :  { %v772_v56 = vadd.f32 1e-12, %v755_v55  ;;  %v1650_v30 = vadd.f32 1e-12, %v745_v19  ;;  %v737_v55 = vpop.xlane.xlu2 %736 }
 0x234   :  { %1215 = vrsqrt.f32 %v772_v56  ;;  %vm920_vm1 = vweird.f32 %v772_v56 }
 0x235   :  { %1217 = vrsqrt.f32 %v1621_v57 }
 0x236   :  { %1219 = vrsqrt.f32 %v1623_v58 }
 0x239   :  { %v757_v18 = vpop.xlane.xlu0 %756  ;;  %v735_v19 = vpop.xlane.xlu1 %734 }
 0x23a   :  { %v1626_v20 = vpop.eup %1215  ;;  %v773_v61 = vadd.f32 1e-12, %v757_v18 }
 0x23b   :  { %v915_v1 = vmul.f32 %v1626_v20, %v772_v56  ;;  %v1634_v3 = vpop.eup %1217  ;;  %vm921_vm0 = vweird.f32 %v1626_v20 }
 0x23c   :  { %1221 = vrsqrt.f32 %v773_v61  ;;  %v1638_v5 = vpop.eup %1219  ;;  %v905_v6 = vmul.f32 %v1634_v3, %v1621_v57  ;;  %vm1672_vm3 = vmor %vm920_vm1, %vm921_vm0  ;;  %vm930_vm4 = vweird.f32 %v773_v61  ;;  %vm911_vm6 = vweird.f32 %v1634_v3 }
 0x23d   :  { %1223 = vrsqrt.f32 %v1629_v63  ;;  %v916_v4 = vmul.f32 %v1626_v20, %v915_v1  ;;  %v895_v16 = vmul.f32 %v1638_v5, %v1623_v58  ;;  %vm901_vm7 = vweird.f32 %v1638_v5  ;;  %vm1695_vm9 = vmor %vm910_vm8, %vm911_vm6 }
 0x23e   :  { %1225 = vrsqrt.f32 %v1632_v2  ;;  %v906_v27 = vmul.f32 %v1634_v3, %v905_v6  ;;  %vm1708_vm11 = vmor %vm900_vm10, %vm901_vm7  ;;  %vm880_vm0 = vweird.f32 %v1632_v2  ;;  %vm870_vm6 = vweird.f32 %v1650_v30 }
 0x23f   :  { %v917_v17 = vmul.f32 0.5, %v916_v4  ;;  %v896_v37 = vmul.f32 %v1638_v5, %v895_v16 }
 0x240   :  { %v907_v44 = vmul.f32 0.5, %v906_v27 }
 0x241   :  { %v743_v13 = vpop.xlane.xlu0 %742  ;;  %v918_v38 = vsub.f32 1.5, %v917_v17  ;;  %v897_v36 = vmul.f32 0.5, %v896_v37 }
 0x242   :  { %v1222_v11 = vpop.eup %1221  ;;  %v1645_v26 = vadd.f32 1e-12, %v743_v13  ;;  %v908_v18 = vsub.f32 1.5, %v907_v44 }
 0x243   :  { %v925_v22 = vmul.f32 %v1222_v11, %v773_v61  ;;  %v1647_v15 = vpop.eup %1223  ;;  %v919_v51 = vmul.f32 %v1626_v20, %v918_v38  ;;  %vm931_vm2 = vweird.f32 %v1222_v11  ;;  %v898_v13 = vsub.f32 1.5, %v897_v36 }
 0x244   :  { %v1652_v34 = vpop.eup %1225  ;;  %v885_v42 = vmul.f32 %v1647_v15, %v1629_v63  ;;  %1227 = vrsqrt.f32 %v1645_v26  ;;  %vm932_vm5 = vmor %vm930_vm4, %vm931_vm2  ;;  %v909_v61 = vmul.f32 %v1634_v3, %v908_v18  ;;  %vm891_vm12 = vweird.f32 %v1647_v15 }
 0x245   :  { %v926_v28 = vmul.f32 %v1222_v11, %v925_v22  ;;  %v875_v9 = vmul.f32 %v1652_v34, %v1632_v2  ;;  %1229 = vrsqrt.f32 %v1650_v30  ;;  %v923_v14 = vsel %vm1672_vm3, %v1626_v20, %v919_v51  ;;  %vm1731_vm15 = vmor %vm890_vm14, %vm891_vm12 }
 0x246   :  { %v886_v54 = vmul.f32 %v1647_v15, %v885_v42  ;;  %1231 = vrsqrt.f32 %v1660_v47  ;;  %v948_v20 = vmul.f32 %v923_v14, %v1531_v53  ;;  %v899_v42 = vmul.f32 %v1638_v5, %v898_v13 }
 0x247   :  { %v927_v10 = vmul.f32 0.5, %v926_v28  ;;  %v876_v4 = vmul.f32 %v1652_v34, %v875_v9  ;;  %v913_v57 = vsel %vm1695_vm9, %v1634_v3, %v909_v61  ;;  %v1712_v51 = vadd.f32 1e-12, %v737_v55 }
 0x248   :  { %v887_v56 = vmul.f32 0.5, %v886_v54  ;;  %v727_v54 = vpop.xlane.xlu2 %726  ;;  %v947_v3 = vmul.f32 %v913_v57, %v1518_v43  ;;  %vm881_vm13 = vweird.f32 %v1652_v34  ;;  %vm860_vm4 = vweird.f32 %v1645_v26 }
 0x249   :  { %v741_v45 = vpop.xlane.xlu0 %740  ;;  %v928_v49 = vsub.f32 1.5, %v927_v10  ;;  %v877_v37 = vmul.f32 0.5, %v876_v4  ;;  %v903_v4 = vsel %vm1708_vm11, %v1638_v5, %v899_v42  ;;  %vm1744_vm1 = vmor %vm880_vm0, %vm881_vm13  ;;  %vm840_vm11 = vweird.f32 %v1660_v47 }
 0x24a   :  { %v1666_v59 = vadd.f32 1e-12, %v741_v45  ;;  %v1668_v1 = vpop.eup %1227  ;;  %v1699_v45 = vadd.f32 1e-12, %v735_v19  ;;  %v888_v9 = vsub.f32 1.5, %v887_v56  ;;  %v946_v5 = vmul.f32 %v903_v4, %v1506_v35  ;;  %v733_v56 = vpop.xlane.xlu1 %732 }
 0x24b   :  { %v929_v16 = vmul.f32 %v1222_v11, %v928_v49  ;;  %v1679_v17 = vpop.eup %1229  ;;  %v855_v22 = vmul.f32 %v1668_v1, %v1645_v26  ;;  %v878_v18 = vsub.f32 1.5, %v877_v37  ;;  %vm861_vm2 = vweird.f32 %v1668_v1 }
 0x24c   :  { %1233 = vrsqrt.f32 %v1666_v59  ;;  %v865_v10 = vmul.f32 %v1679_v17, %v1650_v30  ;;  %v1693_v44 = vpop.eup %1231  ;;  %v889_v14 = vmul.f32 %v1647_v15, %v888_v9  ;;  %v956_v61 = vpack.c.bf16 %v947_v3, %v946_v5 }
 0x24d   :  { %v933_v28 = vsel %vm932_vm5, %v1222_v11, %v929_v16  ;;  %1235 = vrsqrt.f32 %v1699_v45  ;;  %v835_v16 = vmul.f32 %v1693_v44, %v1660_v47  ;;  %v879_v19 = vmul.f32 %v1652_v34, %v878_v18  ;;  %vm1773_vm5 = vmor %vm860_vm4, %vm861_vm2 }
 0x24e   :  { %v949_v38 = vmul.f32 %v933_v28, %v1546_v0  ;;  %v856_v0 = vmul.f32 %v1668_v1, %v855_v22  ;;  %v866_v58 = vmul.f32 %v1679_v17, %v865_v10  ;;  %1237 = vrsqrt.f32 %v1712_v51 }
 0x24f   :  { %v893_v63 = vsel %vm1731_vm15, %v1647_v15, %v889_v14  ;;  %v836_v10 = vmul.f32 %v1693_v44, %v835_v16  ;;  %v883_v42 = vsel %vm1744_vm1, %v1652_v34, %v879_v19  ;;  %vm871_vm3 = vweird.f32 %v1679_v17 }
 0x250   :  { %v957_v53 = vpack.c.bf16 %v949_v38, %v948_v20  ;;  %v857_v6 = vmul.f32 0.5, %v856_v0  ;;  %v867_v43 = vmul.f32 0.5, %v866_v58  ;;  %v351_v15 = vpop.xlane.xlu2 %350  ;;  %v1764_v58 = vadd.f32 1e-12, %v727_v54  ;;  %vm1786_vm7 = vmor %vm870_vm6, %vm871_vm3 }
 0x251   :  { %v731_v27 = vpop.xlane.xlu0 %730  ;;  %v837_v18 = vmul.f32 0.5, %v836_v10  ;;  %v944_v34 = vmul.f32 %v883_v42, %v1493_v24  ;;  %vm841_vm9 = vweird.f32 %v1693_v44  ;;  %vm850_vm10 = vweird.f32 %v1666_v59 }
 0x252   :  { %v1706_v36 = vpop.eup %1233  ;;  %958 = vmatpush.bf16.xpose.msrb.mxu0 %v957_v53  ;;  %1196 = vmatpush.bf16.xpose.msrb.mxu1 %v957_v53  ;;  %v1735_v28 = vadd.f32 1e-12, %v731_v27  ;;  %v858_v37 = vsub.f32 1.5, %v857_v6  ;;  %v1749_v27 = vadd.f32 1e-12, %v733_v56  ;;  %v868_v2 = vsub.f32 1.5, %v867_v43  ;;  %v349_v30 = vpop.xlane.xlu1 %348  ;;  %vm1834_vm13 = vmor %vm840_vm11, %vm841_vm9 }
 0x253   :  { %v845_v55 = vmul.f32 %v1706_v36, %v1666_v59  ;;  %v1742_v20 = vpop.eup %1235  ;;  %v945_v53 = vmul.f32 %v893_v63, %v1498_v29  ;;  %v838_v26 = vsub.f32 1.5, %v837_v18  ;;  %vm851_vm8 = vweird.f32 %v1706_v36 }
 0x254   :  { %v1754_v11 = vpop.eup %1237  ;;  %1239 = vrsqrt.f32 %v1735_v28  ;;  %v815_v9 = vmul.f32 %v1742_v20, %v1699_v45  ;;  %v859_v49 = vmul.f32 %v1668_v1, %v858_v37  ;;  %v869_v4 = vmul.f32 %v1679_v17, %v868_v2  ;;  %vm1818_vm12 = vmor %vm850_vm10, %vm851_vm8 }
 0x255   :  { %v846_v35 = vmul.f32 %v1706_v36, %v845_v55  ;;  %1241 = vrsqrt.f32 %v1749_v27  ;;  %v825_v29 = vmul.f32 %v1754_v11, %v1712_v51  ;;  %v955_v54 = vpack.c.bf16 %v945_v53, %v944_v34 }
 0x256   :  { %v816_v24 = vmul.f32 %v1742_v20, %v815_v9  ;;  %v863_v14 = vsel %vm1773_vm5, %v1668_v1, %v859_v49  ;;  %1243 = vrsqrt.f32 %v1764_v58  ;;  %v873_v43 = vsel %vm1786_vm7, %v1679_v17, %v869_v4 }
 0x257   :  { %v847_v0 = vmul.f32 0.5, %v846_v35  ;;  %v942_v1 = vmul.f32 %v863_v14, %v1562_v12  ;;  %v1804_v63 = vadd.f32 1e-12, %v349_v30  ;;  %v943_v17 = vmul.f32 %v873_v43, %v1526_v50 }
 0x258   :  { %v817_v19 = vmul.f32 0.5, %v816_v24  ;;  %v345_v35 = vpop.xlane.xlu2 %344  ;;  %v839_v38 = vmul.f32 %v1693_v44, %v838_v26  ;;  %v1814_v42 = vadd.f32 1e-12, %v351_v15  ;;  %vm821_vm14 = vweird.f32 %v1742_v20 }
 0x259   :  { %v729_v13 = vpop.xlane.xlu0 %728  ;;  %v848_v55 = vsub.f32 1.5, %v847_v0  ;;  %v954_v50 = vpack.c.bf16 %v943_v17, %v942_v1  ;;  %v1824_v49 = vadd.f32 1e-12, %v345_v35  ;;  %vm831_vm15 = vweird.f32 %v1754_v11 }
 0x25a   :  { %959 = vmatpush.bf16.xpose.msrb.mxu0 %v956_v61  ;;  %1197 = vmatpush.bf16.xpose.msrb.mxu1 %v956_v61  ;;  %v1777_v6 = vadd.f32 1e-12, %v729_v13  ;;  %v1784_v16 = vpop.eup %1239  ;;  %v826_v13 = vmul.f32 %v1754_v11, %v825_v29  ;;  %v818_v0 = vsub.f32 1.5, %v817_v19  ;;  %vm820_vm0 = vweird.f32 %v1699_v45 }
 0x25b   :  { %v1795_v56 = vpop.eup %1241  ;;  %v795_v22 = vmul.f32 %v1784_v16, %v1735_v28  ;;  %v849_v37 = vmul.f32 %v1706_v36, %v848_v55  ;;  %vm1859_vm1 = vmor %vm820_vm0, %vm821_vm14  ;;  %vm830_vm2 = vweird.f32 %v1712_v51  ;;  %vm801_vm4 = vweird.f32 %v1784_v16 }
 0x25c   :  { %1245 = vrsqrt.f32 %v1777_v6  ;;  %v827_v10 = vmul.f32 0.5, %v826_v13  ;;  %v805_v12 = vmul.f32 %v1795_v56, %v1749_v27  ;;  %v1822_v9 = vpop.eup %1243  ;;  %v819_v24 = vmul.f32 %v1742_v20, %v818_v0  ;;  %vm1872_vm3 = vmor %vm830_vm2, %vm831_vm15 }
 0x25d   :  { %v796_v59 = vmul.f32 %v1784_v16, %v795_v22  ;;  %v853_v47 = vsel %vm1818_vm12, %v1706_v36, %v849_v37  ;;  %1247 = vrsqrt.f32 %v1804_v63  ;;  %v843_v36 = vsel %vm1834_vm13, %v1693_v44, %v839_v38 }
 0x25e   :  { %v828_v34 = vsub.f32 1.5, %v827_v10  ;;  %v806_v29 = vmul.f32 %v1795_v56, %v805_v12  ;;  %v941_v4 = vmul.f32 %v853_v47, %v1579_v25  ;;  %v775_v55 = vmul.f32 %v1822_v9, %v1764_v58 }
 0x25f   :  { %v797_v3 = vmul.f32 0.5, %v796_v59  ;;  %v940_v14 = vmul.f32 %v843_v36, %v1503_v33  ;;  %v823_v45 = vsel %vm1859_vm1, %v1742_v20, %v819_v24  ;;  %vm811_vm5 = vweird.f32 %v1795_v56 }
 0x260   :  { %v807_v44 = vmul.f32 0.5, %v806_v29  ;;  %v829_v25 = vmul.f32 %v1754_v11, %v828_v34  ;;  %v776_v22 = vmul.f32 %v1822_v9, %v775_v55  ;;  %v938_v17 = vmul.f32 %v823_v45, %v1543_v62 }
 0x261   :  { %v1761_v57 = vpop.xlane.xlu0 %352  ;;  %v953_v13 = vpack.c.bf16 %v941_v4, %v940_v14  ;;  %v798_v43 = vsub.f32 1.5, %v797_v3  ;;  %vm800_vm6 = vweird.f32 %v1735_v28  ;;  %vm810_vm7 = vweird.f32 %v1749_v27 }
 0x262   :  { %960 = vmatpush.bf16.xpose.msrb.mxu0 %v955_v54  ;;  %1198 = vmatpush.bf16.xpose.msrb.mxu1 %v955_v54  ;;  %v1830_v15 = vpop.eup %1245  ;;  %v808_v51 = vsub.f32 1.5, %v807_v44  ;;  %v833_v20 = vsel %vm1872_vm3, %v1754_v11, %v829_v25  ;;  %v777_v53 = vmul.f32 0.5, %v776_v22  ;;  %v355_v11 = vpop.xlane.xlu1 %354  ;;  %v1898_v62 = vadd.f32 1e-12, %v1761_v57  ;;  %vm1902_vm8 = vmor %vm800_vm6, %vm801_vm4 }
 0x263   :  { %v785_v54 = vmul.f32 %v1830_v15, %v1777_v6  ;;  %v1857_v26 = vpop.eup %1247  ;;  %v799_v12 = vmul.f32 %v1784_v16, %v798_v43  ;;  %v939_v0 = vmul.f32 %v833_v20, %v1515_v41  ;;  %v1908_v36 = vadd.f32 1e-12, %v355_v11  ;;  %vm812_vm9 = vmor %vm810_vm7, %vm811_vm5 }
 0x264   :  { %v389_v37 = vmul.f32 %v1857_v26, %v1804_v63  ;;  %v809_v47 = vmul.f32 %v1795_v56, %v808_v51  ;;  %v778_v57 = vsub.f32 1.5, %v777_v53  ;;  %vm791_vm10 = vweird.f32 %v1830_v15 }
 0x265   :  { %v786_v33 = vmul.f32 %v1830_v15, %v785_v54  ;;  %v952_v29 = vpack.c.bf16 %v939_v0, %v938_v17  ;;  %v803_v28 = vsel %vm1902_vm8, %v1784_v16, %v799_v12  ;;  %vm781_vm11 = vweird.f32 %v1822_v9 }
 0x266   :  { %v390_v59 = vmul.f32 %v1857_v26, %v389_v37  ;;  %v813_v54 = vsel %vm812_vm9, %v1795_v56, %v809_v47  ;;  %v936_v55 = vmul.f32 %v803_v28, %v1592_v32  ;;  %vm790_vm12 = vweird.f32 %v1777_v6 }
 0x267   :  { %v787_v10 = vmul.f32 0.5, %v786_v33  ;;  %v937_v25 = vmul.f32 %v813_v54, %v1560_v8  ;;  %v779_v56 = vmul.f32 %v1822_v9, %v778_v57  ;;  %vm780_vm13 = vweird.f32 %v1764_v58  ;;  %vm1927_vm14 = vmor %vm790_vm12, %vm791_vm10 }
 0x268   :  { %v391_v3 = vmul.f32 0.5, %v390_v59  ;;  %vm404_vm15 = vweird.f32 %v1814_v42  ;;  %vm1938_vm1 = vmor %vm780_vm13, %vm781_vm11  ;;  %vm394_vm2 = vweird.f32 %v1804_v63  ;;  %vm395_vm3 = vweird.f32 %v1857_v26 }
 0x269   :  { %v347_v61 = vpop.xlane.xlu0 %346  ;;  %v788_v4 = vsub.f32 1.5, %v787_v10  ;;  %v951_v43 = vpack.c.bf16 %v937_v25, %v936_v55  ;;  %vm374_vm4 = vweird.f32 %v1824_v49  ;;  %vm1966_vm8 = vmor %vm394_vm2, %vm395_vm3  ;;  %v359_v10 = vpop.xlane.xlu2 %358  ;;  %vm414_vm12 = vweird.f32 %v1898_v62 }
 0x26a   :  { %v1811_v2 = vadd.f32 1e-12, %v347_v61  ;;  %961 = vmatpush.bf16.xpose.msrb.mxu0 %v954_v50  ;;  %1199 = vmatpush.bf16.xpose.msrb.mxu1 %v954_v50  ;;  %v392_v5 = vsub.f32 1.5, %v391_v3  ;;  %v357_v51 = vpop.xlane.xlu1 %356  ;;  %v367_v59 = vadd.f32 1e-12, %v359_v10 }
 0x26b   :  { %v789_v16 = vmul.f32 %v1830_v15, %v788_v4  ;;  %v366_v53 = vadd.f32 1e-12, %v357_v51 }
 0x26c   :  { %1249 = vrsqrt.f32 %v1811_v2  ;;  %vm384_vm10 = vweird.f32 %v1811_v2 }
 0x26d   :  { %1251 = vrsqrt.f32 %v1814_v42  ;;  %v793_v8 = vsel %vm1927_vm14, %v1830_v15, %v789_v16  ;;  %v783_v15 = vsel %vm1938_vm1, %v1822_v9, %v779_v56  ;;  %vm424_vm14 = vweird.f32 %v1908_v36 }
 0x26e   :  { %1253 = vrsqrt.f32 %v1824_v49  ;;  %v934_v12 = vmul.f32 %v783_v15, %v1529_v52  ;;  %vm434_vm2 = vweird.f32 %v366_v53 }
 0x26f   :  { %1255 = vrsqrt.f32 %v1898_v62 }
 0x270   :  { %1257 = vrsqrt.f32 %v1908_v36 }
 0x271   :  { %1259 = vrsqrt.f32 %v366_v53 }
 0x272   :  { %v1863_v30 = vpop.eup %1249  ;;  %962 = vmatpush.bf16.xpose.msrb.mxu0 %v953_v13  ;;  %1200 = vmatpush.bf16.xpose.msrb.mxu1 %v953_v13  ;;  %1261 = vrsqrt.f32 %v367_v59 }
 0x273   :  { %v1870_v1 = vpop.eup %1251  ;;  %v379_v35 = vmul.f32 %v1863_v30, %v1811_v2  ;;  %vm385_vm7 = vweird.f32 %v1863_v30 }
 0x274   :  { %v1877_v61 = vpop.eup %1253  ;;  %v399_v38 = vmul.f32 %v1870_v1, %v1814_v42  ;;  %vm405_vm0 = vweird.f32 %v1870_v1  ;;  %v393_v42 = vmul.f32 %v1857_v26, %v392_v5  ;;  %vm386_vm11 = vmor %vm384_vm10, %vm385_vm7 }
 0x275   :  { %v369_v50 = vmul.f32 %v1877_v61, %v1824_v49  ;;  %v380_v34 = vmul.f32 %v1863_v30, %v379_v35  ;;  %v1931_v33 = vpop.eup %1255  ;;  %vm375_vm5 = vweird.f32 %v1877_v61  ;;  %vm1952_vm6 = vmor %vm404_vm15, %vm405_vm0  ;;  %v935_v49 = vmul.f32 %v793_v8, %v1603_v40 }
 0x276   :  { %v400_v41 = vmul.f32 %v1870_v1, %v399_v38  ;;  %v1944_v19 = vpop.eup %1257  ;;  %v409_v37 = vmul.f32 %v1931_v33, %v1898_v62  ;;  %vm1971_vm9 = vmor %vm374_vm4, %vm375_vm5  ;;  %v397_v0 = vsel %vm1966_vm8, %v1857_v26, %v393_v42  ;;  %vm415_vm13 = vweird.f32 %v1931_v33 }
 0x277   :  { %v370_v27 = vmul.f32 %v1877_v61, %v369_v50  ;;  %v381_v24 = vmul.f32 0.5, %v380_v34  ;;  %v419_v40 = vmul.f32 %v1944_v19, %v1908_v36  ;;  %v950_v50 = vpack.c.bf16 %v935_v49, %v934_v12  ;;  %vm416_vm0 = vmor %vm414_vm12, %vm415_vm13 }
 0x278   :  { %v401_v14 = vmul.f32 0.5, %v400_v41  ;;  %v410_v63 = vmul.f32 %v1931_v33, %v409_v37  ;;  %v450_v18 = vmul.f32 %v397_v0, %v1575_v23  ;;  %vm425_vm15 = vweird.f32 %v1944_v19 }
 0x279   :  { %v371_v44 = vmul.f32 0.5, %v370_v27  ;;  %v382_v13 = vsub.f32 1.5, %v381_v24  ;;  %v420_v47 = vmul.f32 %v1944_v19, %v419_v40  ;;  %vm426_vm1 = vmor %vm424_vm14, %vm425_vm15  ;;  %vm444_vm4 = vweird.f32 %v367_v59 }
 0x27a   :  { %963 = vmatpush.bf16.xpose.msrb.mxu0 %v952_v29  ;;  %1201 = vmatpush.bf16.xpose.msrb.mxu1 %v952_v29  ;;  %v402_v45 = vsub.f32 1.5, %v401_v14  ;;  %v411_v34 = vmul.f32 0.5, %v410_v63 }
 0x27b   :  { %v372_v58 = vsub.f32 1.5, %v371_v44  ;;  %v383_v20 = vmul.f32 %v1863_v30, %v382_v13  ;;  %v421_v41 = vmul.f32 0.5, %v420_v47 }
 0x27c   :  { %v403_v35 = vmul.f32 %v1870_v1, %v402_v45  ;;  %v412_v27 = vsub.f32 1.5, %v411_v34 }
 0x27d   :  { %v373_v17 = vmul.f32 %v1877_v61, %v372_v58  ;;  %v387_v11 = vsel %vm386_vm11, %v1863_v30, %v383_v20  ;;  %v422_v57 = vsub.f32 1.5, %v421_v41 }
 0x27e   :  { %v407_v2 = vsel %vm1952_vm6, %v1870_v1, %v403_v35  ;;  %v449_v30 = vmul.f32 %v387_v11, %v1617_v48 }
 0x27f   :  { %v377_v52 = vsel %vm1971_vm9, %v1877_v61, %v373_v17  ;;  %v451_v29 = vmul.f32 %v407_v2, %v1541_v60  ;;  %v1260_v61 = vpop.eup %1259  ;;  %v413_v60 = vmul.f32 %v1931_v33, %v412_v27  ;;  %v423_v1 = vmul.f32 %v1944_v19, %v422_v57 }
 0x280   :  { %v448_v26 = vmul.f32 %v377_v52, %v1558_v7  ;;  %v1262_v48 = vpop.eup %1261  ;;  %v429_v7 = vmul.f32 %v1260_v61, %v366_v53  ;;  %vm435_vm3 = vweird.f32 %v1260_v61 }
 0x281   :  { %v457_v28 = vpack.c.bf16 %v451_v29, %v450_v18  ;;  %v439_v23 = vmul.f32 %v1262_v48, %v367_v59  ;;  %v417_v54 = vsel %vm416_vm0, %v1931_v33, %v413_v60  ;;  %v427_v62 = vsel %vm426_vm1, %v1944_v19, %v423_v1  ;;  %vm436_vm6 = vmor %vm434_vm2, %vm435_vm3 }
 0x282   :  { %964 = vmatpush.bf16.xpose.msrb.mxu0 %v951_v43  ;;  %1202 = vmatpush.bf16.xpose.msrb.mxu1 %v951_v43  ;;  %v456_v4 = vpack.c.bf16 %v449_v30, %v448_v26  ;;  %v430_v3 = vmul.f32 %v1260_v61, %v429_v7  ;;  %v452_v55 = vmul.f32 %v417_v54, %v1611_v46  ;;  %vm445_vm5 = vweird.f32 %v1262_v48 }
 0x283   :  { %v440_v24 = vmul.f32 %v1262_v48, %v439_v23  ;;  %v453_v36 = vmul.f32 %v427_v62, %v1590_v31  ;;  %vm446_vm7 = vmor %vm444_vm4, %vm445_vm5 }
 0x284   :  { %v431_v14 = vmul.f32 0.5, %v430_v3 }
 0x285   :  { %v441_v16 = vmul.f32 0.5, %v440_v24  ;;  %v458_v44 = vpack.c.bf16 %v453_v36, %v452_v55 }
 0x286   :  { %v432_v25 = vsub.f32 1.5, %v431_v14 }
 0x287   :  { %v442_v5 = vsub.f32 1.5, %v441_v16 }
 0x288   :  { %v433_v56 = vmul.f32 %v1260_v61, %v432_v25 }
 0x289   :  { %v443_v32 = vmul.f32 %v1262_v48, %v442_v5 }
 0x28a   :  { %965 = vmatpush.bf16.xpose.msrb.mxu0 %v950_v50  ;;  %1203 = vmatpush.bf16.xpose.msrb.mxu1 %v950_v50  ;;  %v437_v13 = vsel %vm436_vm6, %v1260_v61, %v433_v56 }
 0x28b   :  { %v447_v43 = vsel %vm446_vm7, %v1262_v48, %v443_v32  ;;  %v454_v46 = vmul.f32 %v437_v13, %v1601_v39 }
 0x28c   :  { %v455_v33 = vmul.f32 %v447_v43, %v1577_v21 }
 0x28e   :  { %v459_v31 = vpack.c.bf16 %v455_v33, %v454_v46 }
 0x291   :  { %966 = vmatmul.bf16.vlgmr.msrb.gmra.mxu0 %v456_v4  ;;  %971 = vmatmul.bf16.vlgmr.msrb.gmra.mxu1 %v457_v28 }
 0x2a1   :  { %976 = vmatmul.bf16.gmra.mxu1 %v458_v44 }
 0x2b1   :  { %981 = vmatmul.bf16.gmra.mxu1 %v459_v31 }
 0x30e   :  { %v967_v45 = vpop.f32.mrf.mxu0  ;;  %v972_v8 = vpop.f32.mrf.mxu1 }
 0x30f   :  { %987 = vst [vmem:[#allocation11] sm:$0xff] %v967_v45 }
 0x310   :  { %989 = vst [vmem:[#allocation11 + $0x10] sm:$0xff] %v972_v8 }
 0x316   :  { %v969_v6 = vpop.f32.mrf.mxu0  ;;  %v974_v58 = vpop.f32.mrf.mxu1 }
 0x317   :  { %988 = vst [vmem:[#allocation11 + $0x8] sm:$0xff] %v969_v6 }
 0x318   :  { %990 = vst [vmem:[#allocation11 + $0x18] sm:$0xff] %v974_v58 }
 0x31e   :  { %v977_v19 = vpop.f32.mrf.mxu1 }
 0x31f   :  { %991 = vst [vmem:[#allocation11 + $0x20] sm:$0xff] %v977_v19 }
 0x326   :  { %v979_v42 = vpop.f32.mrf.mxu1 }
 0x327   :  { %992 = vst [vmem:[#allocation11 + $0x28] sm:$0xff] %v979_v42 }
 0x32e   :  { %v982_v15 = vpop.f32.mrf.mxu1 }
 0x32f   :  { %993 = vst [vmem:[#allocation11 + $0x30] sm:$0xff] %v982_v15 }
 0x336   :  { %v984_v21 = vpop.f32.mrf.mxu1 }
 0x337   :  { %994 = vst [vmem:[#allocation11 + $0x38] sm:$0xff] %v984_v21 }
 0x338   :  { %1007 = dma.vmem_to_hbm [thread:$0]  %s1000_s21, 1024, %s1002_s24, [#allocation4], %s1423_s25, %s1423_s25, %s1424_s26  }
 0x339   :  { %1413 = dma.done.wait [#allocation4], 1024  }
 0x33a   :  { %1414 = vsyncadd [#allocation4], 4294966272 }
 0x33b   :  { %1012 = vsyncpa [#allocation3], 1 }
 0x33c   :  { %1013 = vsyncpa [#allocation6], 1 }
 0x33d   :  { %1014 = vsyncpa [#allocation9], 1 }
 0x33e   :  { %1015 = vsyncpa [#allocation4], 1 }

</bundles_post_ra>
